<compile_context>
chip_gen: v7x
topology: tpu7x:2x2x1
jax: 0.10.0
libtpu: 0.0.40
codegen_flags: <defaults>
</compile_context>

<pallas_src>
from functools import partial

import jax
import jax.numpy as jnp
from jax.experimental import pallas as pl
from jax.experimental.pallas import tpu as pltpu


def _attention_kernel(x_ref, wfc_ref, bfc_ref, whead_ref, bhead_ref,
                      out_ref, acc_ref, *, inv_temp, kernel_off, kernel_num):
    s = pl.program_id(1)

    @pl.when(s == 0)
    def _():
        acc_ref[...] = jnp.zeros_like(acc_ref)

    # Partial spatial sum of this (tile_b, C_in, tile_hw) block, accumulated
    # in f32 regardless of the input dtype.
    acc_ref[...] += jnp.sum(x_ref[...].astype(jnp.float32), axis=-1)

    @pl.when(s == pl.num_programs(1) - 1)
    def _():
        # avgpool + fc + BN(eval) + ReLU.  1/(H*W) and BN are folded into
        # wfc/bfc at trace time, so this is a plain matmul + bias + relu.
        h = jnp.maximum(
            jnp.dot(acc_ref[...], wfc_ref[...],
                    preferred_element_type=jnp.float32) + bfc_ref[...],
            0.0)

        # One fused head matmul over the concatenated
        # (channel | filter | spatial | kernel) output slab, padded to a
        # multiple of 128 lanes for unmasked stores.
        z = (jnp.dot(h, whead_ref[...], preferred_element_type=jnp.float32)
             + bhead_ref[...]) * inv_temp

        sig = jax.nn.sigmoid(z)

        # Softmax over only the kernel-attention lanes, selected by lane index
        # (keeps everything as VPU/EUP + one lane reduce; no lane shuffles).
        lane = jax.lax.broadcasted_iota(jnp.int32, z.shape, dimension=1)
        is_kernel = (lane >= kernel_off) & (lane < kernel_off + kernel_num)
        zk = jnp.where(is_kernel, z, -jnp.inf)
        m = jnp.max(zk, axis=-1, keepdims=True)
        e = jnp.exp(zk - m)
        sm = e / jnp.sum(e, axis=-1, keepdims=True)

        out_ref[...] = jnp.where(is_kernel, sm, sig).astype(out_ref.dtype)


def attention_forward(x, params, *, kernel_size, kernel_num,
                      temperature=1.0, bn_eps=1e-5):
    B, C_in, H, W = x.shape
    HW = H * W
    xf = x.reshape(B, C_in, HW)          # keep source dtype; no upcast in HBM

    A = params["fc_w"].shape[1]
    C_out = params["filter_w"].shape[1]

    # ---- trace-time folding (done once by XLA, zero kernel cost) -----------
    scale = params["bn_gamma"] * jax.lax.rsqrt(params["bn_var"] + bn_eps)  # (1, A)
    wfc = (params["fc_w"] * scale) / float(HW)                              # (C_in, A)
    bfc = params["bn_beta"] - params["bn_mean"] * scale                     # (1, A)

    w_head = jnp.concatenate([params["channel_w"], params["filter_w"],
                              params["spatial_w"], params["kernel_w"]], axis=1)
    b_head = jnp.concatenate([params["channel_b"], params["filter_b"],
                              params["spatial_b"], params["kernel_b"]], axis=1)
    T = w_head.shape[1]                       # C_in + C_out + k*k + K
    T_pad = ((T + 127) // 128) * 128          # lane-dense output slab
    if T_pad != T:
        w_head = jnp.pad(w_head, ((0, 0), (0, T_pad - T)))
        b_head = jnp.pad(b_head, ((0, 0), (0, T_pad - T)))
    kernel_off = C_in + C_out + kernel_size * kernel_size

    # ---- tiling -------------------------------------------------------------
    # Batch tile: multiple of 8 sublanes when possible, capped at 128 rows.
    tile_b = B
    if B % 8 == 0:
        tile_b = 8
        while tile_b * 2 <= min(B, 128) and B % (tile_b * 2) == 0:
            tile_b *= 2

    # Spatial tile: multiple of 128 lanes dividing HW, sized so the
    # double-buffered x block stays well under the scoped-VMEM default
    # (conservative for v7x's 64 MiB physical VMEM).
    budget = 8 * 1024 * 1024
    max_hw = max(128, budget // (tile_b * max(C_in, 8) * x.dtype.itemsize))
    tile_hw = HW
    if HW % 128 == 0:
        tile_hw = 128
        while tile_hw * 2 <= max_hw and HW % (tile_hw * 2) == 0:
            tile_hw *= 2

    grid = (B // tile_b, HW // tile_hw)

    kernel = partial(_attention_kernel,
                     inv_temp=1.0 / temperature,
                     kernel_off=kernel_off,
                     kernel_num=kernel_num)

    out = pl.pallas_call(
        kernel,
        out_shape=jax.ShapeDtypeStruct((B, T_pad), jnp.float32),
        grid_spec=pltpu.PrefetchScalarGridSpec(
            num_scalar_prefetch=0,
            grid=grid,
            in_specs=[
                pl.BlockSpec((tile_b, C_in, tile_hw), lambda b, s: (b, 0, s)),
                pl.BlockSpec((C_in, A), lambda b, s: (0, 0)),
                pl.BlockSpec((1, A), lambda b, s: (0, 0)),
                pl.BlockSpec((A, T_pad), lambda b, s: (0, 0)),
                pl.BlockSpec((1, T_pad), lambda b, s: (0, 0)),
            ],
            out_specs=pl.BlockSpec((tile_b, T_pad), lambda b, s: (b, 0)),
            scratch_shapes=[pltpu.VMEM((tile_b, C_in), jnp.float32)],
        ),
        compiler_params=pltpu.CompilerParams(
            dimension_semantics=("parallel", "arbitrary")),
    )(xf, wfc, bfc, w_head, b_head)

    # Split the lane-dense slab back into the exact PyTorch output shapes.
    ch = out[:, :C_in].reshape(B, C_in, 1, 1)
    fl = out[:, C_in:C_in + C_out].reshape(B, C_out, 1, 1)
    sp = out[:, C_in + C_out:kernel_off].reshape(
        B, 1, 1, 1, kernel_size, kernel_size)
    ke = out[:, kernel_off:kernel_off + kernel_num].reshape(
        B, kernel_num, 1, 1, 1, 1)
    return ch, fl, sp, ke


def init_params(key, in_channels, out_channels, kernel_size, kernel_num,
                reduction=0.0625, min_channels=16):
    """Deterministic parameter init mirroring the module's _initialize_weights."""
    attention_channels = max(int(in_channels * reduction), min_channels)
    ks = jax.random.split(key, 5)

    def kaiming_fan_out(k, out_c, in_c):
        # Conv2d 1x1 weight of shape (out_c, in_c, 1, 1); fan_out = out_c.
        std = (2.0 / out_c) ** 0.5
        w = std * jax.random.normal(k, (out_c, in_c), jnp.float32)
        return w.T  # stored as (in_dim, out_dim) so the kernel does h @ W

    A = attention_channels
    params = {
        "fc_w": kaiming_fan_out(ks[0], A, in_channels),                    # (C_in, A)
        "bn_gamma": jnp.ones((1, A), jnp.float32),
        "bn_beta": jnp.zeros((1, A), jnp.float32),
        "bn_mean": jnp.zeros((1, A), jnp.float32),
        "bn_var": jnp.ones((1, A), jnp.float32),
        "channel_w": kaiming_fan_out(ks[1], in_channels, A),               # (A, C_in)
        "channel_b": jnp.zeros((1, in_channels), jnp.float32),
        "filter_w": kaiming_fan_out(ks[2], out_channels, A),               # (A, C_out)
        "filter_b": jnp.zeros((1, out_channels), jnp.float32),
        "spatial_w": kaiming_fan_out(ks[3], kernel_size * kernel_size, A), # (A, k*k)
        "spatial_b": jnp.zeros((1, kernel_size * kernel_size), jnp.float32),
        "kernel_w": kaiming_fan_out(ks[4], kernel_num, A),                 # (A, K)
        "kernel_b": jnp.zeros((1, kernel_num), jnp.float32),
    }
    return params


def _reference(x, params, *, kernel_size, kernel_num, temperature, bn_eps=1e-5):
    """Pure-JAX reference of the PyTorch forward (eval-mode BN)."""
    B = x.shape[0]
    p = x.astype(jnp.float32).mean(axis=(2, 3))                        # (B, C_in)
    scale = params["bn_gamma"] * jax.lax.rsqrt(params["bn_var"] + bn_eps)
    y = p @ params["fc_w"]
    h = jnp.maximum((y - params["bn_mean"]) * scale + params["bn_beta"], 0.0)

    def head(w, b):
        return (h @ w + b) / temperature

    ch = jax.nn.sigmoid(head(params["channel_w"], params["channel_b"]))
    fl = jax.nn.sigmoid(head(params["filter_w"], params["filter_b"]))
    sp = jax.nn.sigmoid(head(params["spatial_w"], params["spatial_b"]))
    ke = jax.nn.softmax(head(params["kernel_w"], params["kernel_b"]), axis=-1)
    return (ch.reshape(B, -1, 1, 1),
            fl.reshape(B, -1, 1, 1),
            sp.reshape(B, 1, 1, 1, kernel_size, kernel_size),
            ke.reshape(B, -1, 1, 1, 1, 1))


if __name__ == "__main__":
    key = jax.random.PRNGKey(0)
    k_x, k_p = jax.random.split(key)

    # Module config (groups=1 and kernel_size>1, kernel_num>1 -> all four
    # attention branches are active, none is `skip`).
    in_channels, out_channels = 4, 8
    kernel_size, kernel_num = 3, 4
    temperature = 1.0

    B, H, W = 2, 16, 16
    x = jax.random.normal(k_x, (B, in_channels, H, W), jnp.float32)

    params = init_params(k_p, in_channels, out_channels, kernel_size, kernel_num)

    outs = attention_forward(x, params,
                             kernel_size=kernel_size,
                             kernel_num=kernel_num,
                             temperature=temperature)
    outs = jax.block_until_ready(outs)

    ch, fl, sp, ke = outs
    assert ch.shape == (B, in_channels, 1, 1)
    assert fl.shape == (B, out_channels, 1, 1)
    assert sp.shape == (B, 1, 1, 1, kernel_size, kernel_size)
    assert ke.shape == (B, kernel_num, 1, 1, 1, 1)

    refs = _reference(x, params, kernel_size=kernel_size,
                      kernel_num=kernel_num, temperature=temperature)
    for got, ref in zip(outs, refs):
        assert jnp.allclose(got, ref, atol=1e-4, rtol=1e-4), (
            "mismatch vs pure-JAX reference")

    print("KERNEL_OK")
</pallas_src>

<mosaic_0001>
module attributes {stable_mosaic.version = 11 : i64} {
  func.func @_attention_kernel(%arg0: i32, %arg1: i32, %arg2: memref<2x4x256xf32, #tpu.memory_space<vmem>>, %arg3: memref<4x16xf32, #tpu.memory_space<vmem>>, %arg4: memref<1x16xf32, #tpu.memory_space<vmem>>, %arg5: memref<16x128xf32, #tpu.memory_space<vmem>>, %arg6: memref<1x128xf32, #tpu.memory_space<vmem>>, %arg7: memref<2x128xf32, #tpu.memory_space<vmem>>, %arg8: memref<2x4xf32, #tpu.memory_space<vmem>>) attributes {dimension_semantics = [#tpu.dimension_semantics<parallel>, #tpu.dimension_semantics<arbitrary>], iteration_bounds = array<i64: 1, 1>, scalar_prefetch = 0 : i64, scratch_operands = 1 : i64, tpu.core_type = #tpu.core_type<tc>, window_params = [{transform_indices = @transform_0, window_bounds = array<i64: 2, 4, 256>}, {pipeline_mode = #tpu.pipeline_mode<synchronous>, transform_indices = @transform_1, window_bounds = array<i64: 4, 16>}, {pipeline_mode = #tpu.pipeline_mode<synchronous>, transform_indices = @transform_2, window_bounds = array<i64: 1, 16>}, {pipeline_mode = #tpu.pipeline_mode<synchronous>, transform_indices = @transform_3, window_bounds = array<i64: 16, 128>}, {pipeline_mode = #tpu.pipeline_mode<synchronous>, transform_indices = @transform_4, window_bounds = array<i64: 1, 128>}, {transform_indices = @transform_5, window_bounds = array<i64: 2, 128>}]} {
    %c0_i32 = arith.constant 0 : i32
    %0 = arith.cmpi eq, %arg1, %c0_i32 : i32
    %1 = arith.extui %0 : i1 to i32
    %c0_i32_0 = arith.constant 0 : i32
    %2 = arith.cmpi ne, %1, %c0_i32_0 : i32
    scf.if %2 {
      %cst_9 = arith.constant 0.000000e+00 : f32
      %11 = vector.broadcast %cst_9 : f32 to vector<2x4xf32>
      %c0_10 = arith.constant 0 : index
      %c0_11 = arith.constant 0 : index
      %12 = vector.load %arg8[%c0_10, %c0_11] : memref<2x4xf32, #tpu.memory_space<vmem>>, vector<2x4xf32>
      tpu.vector_store %arg8[%c0_10, %c0_11], %11 {strides = array<i32>} : memref<2x4xf32, #tpu.memory_space<vmem>>, vector<2x4xf32>,
    } else {
    }
    %c0 = arith.constant 0 : index
    %c0_1 = arith.constant 0 : index
    %3 = vector.load %arg8[%c0, %c0_1] : memref<2x4xf32, #tpu.memory_space<vmem>>, vector<2x4xf32>
    %c0_2 = arith.constant 0 : index
    %c0_3 = arith.constant 0 : index
    %c0_4 = arith.constant 0 : index
    %4 = vector.load %arg2[%c0_2, %c0_3, %c0_4] : memref<2x4x256xf32, #tpu.memory_space<vmem>>, vector<2x4x256xf32>
    %cst = arith.constant dense<0.000000e+00> : vector<2x4xf32>
    %5 = vector.multi_reduction <add>, %4, %cst [2] : vector<2x4x256xf32> to vector<2x4xf32>
    %6 = arith.addf %3, %5 : vector<2x4xf32>
    %c0_5 = arith.constant 0 : index
    %c0_6 = arith.constant 0 : index
    %7 = vector.load %arg8[%c0_5, %c0_6] : memref<2x4xf32, #tpu.memory_space<vmem>>, vector<2x4xf32>
    tpu.vector_store %arg8[%c0_5, %c0_6], %6 {strides = array<i32>} : memref<2x4xf32, #tpu.memory_space<vmem>>, vector<2x4xf32>,
    %c0_i32_7 = arith.constant 0 : i32
    %8 = arith.cmpi eq, %arg1, %c0_i32_7 : i32
    %9 = arith.extui %8 : i1 to i32
    %c0_i32_8 = arith.constant 0 : i32
    %10 = arith.cmpi ne, %9, %c0_i32_8 : i32
    scf.if %10 {
      %c0_9 = arith.constant 0 : index
      %c0_10 = arith.constant 0 : index
      %11 = vector.load %arg8[%c0_9, %c0_10] : memref<2x4xf32, #tpu.memory_space<vmem>>, vector<2x4xf32>
      %c0_11 = arith.constant 0 : index
      %c0_12 = arith.constant 0 : index
      %12 = vector.load %arg3[%c0_11, %c0_12] : memref<4x16xf32, #tpu.memory_space<vmem>>, vector<4x16xf32>
      %cst_13 = arith.constant dense<0.000000e+00> : vector<2x16xf32>
      %13 = tpu.matmul %11, %12, %cst_13 {dimension_numbers = #tpu.dot_dimension_numbers<[1], [0], [0], [1], [0, 0, 1, 1], [], []>} : vector<2x4xf32>, vector<4x16xf32>, vector<2x16xf32> -> vector<2x16xf32>
      %c0_14 = arith.constant 0 : index
      %c0_15 = arith.constant 0 : index
      %14 = vector.load %arg4[%c0_14, %c0_15] : memref<1x16xf32, #tpu.memory_space<vmem>>, vector<1x16xf32>
      %15 = vector.broadcast %14 : vector<1x16xf32> to vector<2x16xf32>
      %16 = arith.addf %13, %15 : vector<2x16xf32>
      %cst_16 = arith.constant 0.000000e+00 : f32
      %17 = vector.broadcast %cst_16 : f32 to vector<2x16xf32>
      %18 = arith.maximumf %16, %17 : vector<2x16xf32>
      %c0_17 = arith.constant 0 : index
      %c0_18 = arith.constant 0 : index
      %19 = vector.load %arg5[%c0_17, %c0_18] : memref<16x128xf32, #tpu.memory_space<vmem>>, vector<16x128xf32>
      %cst_19 = arith.constant dense<0.000000e+00> : vector<2x128xf32>
      %20 = tpu.matmul %18, %19, %cst_19 {dimension_numbers = #tpu.dot_dimension_numbers<[1], [0], [0], [1], [0, 0, 1, 1], [], []>} : vector<2x16xf32>, vector<16x128xf32>, vector<2x128xf32> -> vector<2x128xf32>
      %c0_20 = arith.constant 0 : index
      %c0_21 = arith.constant 0 : index
      %21 = vector.load %arg6[%c0_20, %c0_21] : memref<1x128xf32, #tpu.memory_space<vmem>>, vector<1x128xf32>
      %22 = vector.broadcast %21 : vector<1x128xf32> to vector<2x128xf32>
      %23 = arith.addf %20, %22 : vector<2x128xf32>
      %cst_22 = arith.constant 1.000000e+00 : f32
      %24 = vector.broadcast %cst_22 : f32 to vector<2x128xf32>
      %25 = arith.mulf %23, %24 : vector<2x128xf32>
      %26 = arith.negf %25 : vector<2x128xf32>
      %27 = math.exp %26 : vector<2x128xf32>
      %cst_23 = arith.constant 1.000000e+00 : f32
      %28 = vector.broadcast %cst_23 : f32 to vector<2x128xf32>
      %29 = arith.addf %28, %27 : vector<2x128xf32>
      %30 = arith.divf %28, %29 : vector<2x128xf32>
      %31 = tpu.iota {dimensions = array<i32: 1>} : vector<2x128xi32>
      %c21_i32 = arith.constant 21 : i32
      %32 = vector.broadcast %c21_i32 : i32 to vector<2x128xi32>
      %33 = arith.cmpi sge, %31, %32 : vector<2x128xi32>
      %c25_i32 = arith.constant 25 : i32
      %34 = vector.broadcast %c25_i32 : i32 to vector<2x128xi32>
      %35 = arith.cmpi slt, %31, %34 : vector<2x128xi32>
      %36 = arith.andi %33, %35 : vector<2x128xi1>
      %cst_24 = arith.constant 0xFF800000 : f32
      %37 = vector.broadcast %cst_24 : f32 to vector<2x128xf32>
      %38 = arith.select %36, %25, %37 : vector<2x128xi1>, vector<2x128xf32>
      %cst_25 = arith.constant dense<0xFF800000> : vector<2xf32>
      %39 = vector.multi_reduction <maximumf>, %38, %cst_25 [1] : vector<2x128xf32> to vector<2xf32>
      %40 = vector.shape_cast %39 : vector<2xf32> to vector<2x1xf32>
      %41 = vector.broadcast %40 : vector<2x1xf32> to vector<2x128xf32>
      %42 = arith.subf %38, %41 : vector<2x128xf32>
      %43 = math.exp %42 : vector<2x128xf32>
      %cst_26 = arith.constant dense<0.000000e+00> : vector<2xf32>
      %44 = vector.multi_reduction <add>, %43, %cst_26 [1] : vector<2x128xf32> to vector<2xf32>
      %45 = vector.shape_cast %44 : vector<2xf32> to vector<2x1xf32>
      %46 = vector.broadcast %45 : vector<2x1xf32> to vector<2x128xf32>
      %47 = arith.divf %43, %46 : vector<2x128xf32>
      %48 = arith.select %36, %47, %30 : vector<2x128xi1>, vector<2x128xf32>
      %c0_27 = arith.constant 0 : index
      %c0_28 = arith.constant 0 : index
      %49 = vector.load %arg7[%c0_27, %c0_28] : memref<2x128xf32, #tpu.memory_space<vmem>>, vector<2x128xf32>
      tpu.vector_store %arg7[%c0_27, %c0_28], %48 {strides = array<i32>} : memref<2x128xf32, #tpu.memory_space<vmem>>, vector<2x128xf32>,
    } else {
    }
    return
  }
  func.func @transform_0(%arg0: i32, %arg1: i32) -> (i32, i32, i32) {
    %c0_i32 = arith.constant 0 : i32
    %c0_i32_0 = arith.constant 0 : i32
    return %arg0, %c0_i32, %arg1 : i32, i32, i32
  }
  func.func @transform_1(%arg0: i32, %arg1: i32) -> (i32, i32) {
    %c0_i32 = arith.constant 0 : i32
    %c0_i32_0 = arith.constant 0 : i32
    %c0_i32_1 = arith.constant 0 : i32
    return %c0_i32, %c0_i32_0 : i32, i32
  }
  func.func @transform_2(%arg0: i32, %arg1: i32) -> (i32, i32) {
    %c0_i32 = arith.constant 0 : i32
    %c0_i32_0 = arith.constant 0 : i32
    %c0_i32_1 = arith.constant 0 : i32
    return %c0_i32, %c0_i32_0 : i32, i32
  }
  func.func @transform_3(%arg0: i32, %arg1: i32) -> (i32, i32) {
    %c0_i32 = arith.constant 0 : i32
    %c0_i32_0 = arith.constant 0 : i32
    %c0_i32_1 = arith.constant 0 : i32
    return %c0_i32, %c0_i32_0 : i32, i32
  }
  func.func @transform_4(%arg0: i32, %arg1: i32) -> (i32, i32) {
    %c0_i32 = arith.constant 0 : i32
    %c0_i32_0 = arith.constant 0 : i32
    %c0_i32_1 = arith.constant 0 : i32
    return %c0_i32, %c0_i32_0 : i32, i32
  }
  func.func @transform_5(%arg0: i32, %arg1: i32) -> (i32, i32) {
    %c0_i32 = arith.constant 0 : i32
    %c0_i32_0 = arith.constant 0 : i32
    return %arg0, %c0_i32 : i32, i32
  }
}

</mosaic_0001>

<bundles_post_ra>
// kernel: tpu_custom_call.1
= control target key start
LH: loop header
LB: loop body
LE: loop exit
PB: predicated region body
PF: predicated region fallthrough
CT: control target
= control target key end

     0   :  { %10 = vsyncpa [#allocation4], 0  ;;  %s571_s0 = inlined_call_operand.hbm [shape: f32[2,4,256], index: 0, kind: input, shape index: {}]   ;;  %s572_s1 = inlined_call_operand.hbm [shape: f32[4,16], index: 1, kind: input, shape index: {}]   ;;  %s573_s2 = inlined_call_operand.vmem [shape: f32[1,16], index: 2, kind: input, shape index: {}]   ;;  %s574_s3 = inlined_call_operand.hbm [shape: f32[16,128], index: 3, kind: input, shape index: {}]   ;;  %s575_s4 = inlined_call_operand.vmem [shape: f32[1,128], index: 4, kind: input, shape index: {}]   ;;  %s576_s5 = inlined_call_operand.hbm [shape: f32[2,128], index: 5, kind: output, shape index: {}]  }
   0x1   :  { %11 = vsyncpa [#allocation7], 0 }
   0x2   :  { %12 = vsyncpa [#allocation5], 0  ;;  %s456_s18 = smov [#allocation6]   ;;  %s457_s20 = smov [#allocation3]  }
   0x3   :  { %s31_s19 = sshll.u32 %s456_s18, 4  ;;  %s18_s21 = sshll.u32 %s457_s20, 4  ;;  %s32_s19 = int_to_ptr.vmem [resolvable:$true] %s31_s19  ;;  %s495_s21 = int_to_ptr.vmem [resolvable:$true] %s18_s21 }
   0x4   :  { %s362_s24 = scalar_lea.hbm %s572_s1, 64 }
   0x5   :  { %p363_p0 = scmp.ne.s32.totalorder %s572_s1, %s362_s24  ;;  %p366_p1 = scmp.lt.u32.totalorder %s362_s24, %s572_s1 }
   0x7   :  { %p368_p2 = pnand %p366_p1, %p363_p0 }
   0x9   :  { %371 = shalt.err (!%p368_p2)
}
   0xa   :  { %s372_s29 = scalar_lea.vmem %s32_s19, 64  ;;  %p377_p4 = scmp.lt.s32.totalorder %s32_s19, %s32_s19 }
   0xb   :  { %p373_p3 = scmp.ne.s32.totalorder %s32_s19, %s372_s29  ;;  %p378_p5 = scmp.lt.s32.totalorder %s372_s29, %s372_s29 }
   0xd   :  { %p379_p6 = por %p378_p5, %p377_p4 }
   0xf   :  { %p380_p7 = pnand %p379_p6, %p373_p3 }
  0x11   :  { %383 = shalt.err (!%p380_p7)
}
  0x12   :  { %34 = dma.hbm_to_vmem [thread:$0]  %s572_s1, 64, %s32_s19, [#allocation7]  }
  0x13   :  { %s384_s9 = scalar_lea.hbm %s571_s0, 256 }
  0x14   :  { %p385_p8 = scmp.ne.s32.totalorder %s571_s0, %s384_s9  ;;  %p388_p9 = scmp.lt.u32.totalorder %s384_s9, %s571_s0 }
  0x16   :  { %p390_p10 = pnand %p388_p9, %p385_p8 }
  0x18   :  { %393 = shalt.err (!%p390_p10)
}
  0x19   :  { %s394_s14 = scalar_lea.vmem %s495_s21, 256  ;;  %p399_p12 = scmp.lt.s32.totalorder %s495_s21, %s495_s21 }
  0x1a   :  { %p395_p11 = scmp.ne.s32.totalorder %s495_s21, %s394_s14  ;;  %p400_p13 = scmp.lt.s32.totalorder %s394_s14, %s394_s14 }
  0x1c   :  { %p401_p0 = por %p400_p13, %p399_p12 }
  0x1e   :  { %p402_p1 = pnand %p401_p0, %p395_p11 }
  0x20   :  { %405 = shalt.err (!%p402_p1)
}
  0x21   :  { %s458_s1 = smov 128   ;;  %s459_s15 = smov 8  }
  0x22   :  { %24 = dma.hbm_to_vmem [thread:$0]  %s571_s0, 256, %s495_s21, [#allocation4], %s458_s1, %s458_s1, %s459_s15  }
  0x23   :  { %s460_s18 = smov [#allocation8]   ;;  %s406_s23 = scalar_lea.hbm %s574_s3, 256 }
  0x24   :  { %s42_s19 = sshll.u32 %s460_s18, 4  ;;  %p407_p2 = scmp.ne.s32.totalorder %s574_s3, %s406_s23  ;;  %s43_s19 = int_to_ptr.vmem [resolvable:$true] %s42_s19 }
  0x25   :  { %p410_p3 = scmp.lt.u32.totalorder %s406_s23, %s574_s3 }
  0x27   :  { %p412_p4 = pnand %p410_p3, %p407_p2 }
  0x29   :  { %415 = shalt.err (!%p412_p4)
}
  0x2a   :  { %s416_s28 = scalar_lea.vmem %s43_s19, 256  ;;  %p421_p6 = scmp.lt.s32.totalorder %s43_s19, %s43_s19 }
  0x2b   :  { %p417_p5 = scmp.ne.s32.totalorder %s43_s19, %s416_s28  ;;  %p422_p7 = scmp.lt.s32.totalorder %s416_s28, %s416_s28 }
  0x2d   :  { %p423_p8 = por %p422_p7, %p421_p6 }
  0x2f   :  { %p424_p9 = pnand %p423_p8, %p417_p5 }
  0x31   :  { %427 = shalt.err (!%p424_p9)
}
  0x32   :  { %48 = dma.hbm_to_vmem [thread:$0]  %s574_s3, 256, %s43_s19, [#allocation7], %s458_s1, %s458_s1, %s459_s15  }
  0x33   :  { %450 = dma.done.wait [#allocation4], 256  }
  0x34   :  { %451 = vsyncadd [#allocation4], 4294967040 }
  0x35   :  { %452 = dma.done.wait [#allocation7], 320  }
  0x36   :  { %453 = vsyncadd [#allocation7], 4294966976  ;;  %vm75_vm0 = vcmask 1043456   ;;  %v67_v0 = vld [vmem:[#allocation3] sm:$0xff]  ;;  %v68_v1 = vld [vmem:[#allocation3 + $0x8] sm:$0xff]  ;;  %vm64_vm1 = vcmask 25600   ;;  %v88_v12 = vlaneseq }
  0x37   :  { %v71_v2 = vcombine.high %v67_v0, %v67_v0  ;;  %v76_v3 = vsel %vm75_vm0, %v67_v0, 0.0  ;;  %v72_v4 = vcombine.high %v68_v1, %v68_v1  ;;  %v81_v6 = vsel %vm75_vm0, %v68_v1, 0.0  ;;  %v108_v11 = vld [vmem:[#allocation6] sm:$0xf]  ;;  %v194_v24 = vld [vmem:[#allocation8] sm:$0xff]  ;;  %v195_v25 = vld [vmem:[#allocation8 + $0x8] sm:$0xff] }
  0x38   :  { %v461_v10 = vmov 0.0   ;;  %vm462_vm2 = vmmov 0   ;;  %v89_v13 = vand.u32 127, %v88_v12  ;;  %v91_v14 = vshrl.u32 %v88_v12, 7  ;;  %v317_v28 = vld [vmem:[%s573_s2] ss:$0 sm:$0xff] }
  0x39   :  { %v77_v5 = vsel %vm75_vm0, %v71_v2, 0.0  ;;  %v82_v7 = vsel %vm75_vm0, %v72_v4, 0.0  ;;  %65 = vst.msk [vmem:[#allocation2] sm:$0x3] %vm64_vm1, %v461_v10  ;;  %328 = vmatprep.subr.mxu0 %v461_v10  ;;  %330 = vmatprep.mubr.msk.f32.mxu0 %vm462_vm2, %v461_v10  ;;  %vm98_vm3 = vcmask 1041409   ;;  %vm116_vm4 = vcmask 31744  }
  0x3a   :  { %v78_v8 = vadd.f32 %v77_v5, %v76_v3  ;;  %v83_v9 = vadd.f32 %v82_v7, %v81_v6  ;;  %329 = vmatpush3.msk.msra.mxu0 %vm75_vm0, %v108_v11  ;;  %337 = vmatprep.mubr.msk.f32.mxu1 %vm462_vm2, %v461_v10  ;;  %v92_v16 = vsub.s32 %v89_v13, %v91_v14  ;;  %v463_v27 = vmov 0.0|0.0   ;;  %v320_v33 = vld [vmem:[%s575_s4] ss:$0 sm:$0xff]  ;;  %s464_s2 = smov [#allocation9]  }
  0x3b   :  { %v341_v26 = vpack.c.bf16 %v195_v25, %v194_v24  ;;  %340 = vmatprep.subr.bf16.mxu1 %v463_v27  ;;  %vm203_vm5 = vcmask 130048   ;;  %vm283_vm6 = vcmp.ge.s32.totalorder %v89_v13, 21  ;;  %vm284_vm7 = vcmp.lt.s32.totalorder %v89_v13, 25  ;;  %s307_s4 = sshll.u32 %s464_s2, 4  ;;  %s308_s4 = int_to_ptr.vmem [resolvable:$true] %s307_s4 }
  0x3c   :  { %79 = vadd.xlane.f32.xlu0 %v78_v8  ;;  %vm551_vm8 = vmand %vm283_vm6, %vm284_vm7  ;;  %vm287_vm9 = vcmask 1041408   ;;  %s428_s7 = scalar_lea.vmem %s308_s4, 32  ;;  %p433_p11 = scmp.lt.s32.totalorder %s308_s4, %s308_s4 }
  0x3d   :  { %342 = vmatpush3.bf16.msra.mxu1 %v341_v26  ;;  %p429_p10 = scmp.ne.s32.totalorder %s308_s4, %s428_s7  ;;  %p434_p12 = scmp.lt.s32.totalorder %s428_s7, %s428_s7 }
  0x3f   :  { %p435_p13 = por %p434_p12, %p433_p11 }
  0x40   :  { %84 = vadd.xlane.f32.xlu0 %v83_v9  ;;  %v66_v20 = vld [vmem:[#allocation2] sm:$0x3] }
  0x41   :  { %p436_p0 = pnand %p435_p13, %p429_p10 }
  0xc9   :  { %v80_v15 = vpop.xlane.xlu0 %79 }
  0xca   :  { %v93_v18 = vrot.slane %v80_v15, %v92_v16 }
  0xcd   :  { %v85_v17 = vpop.xlane.xlu0 %84 }
  0xce   :  { %v97_v19 = vrot.slane %v85_v17, %v92_v16 }
  0xd0   :  { %v99_v21 = vsel %vm98_vm3, %v97_v19, %v93_v18 }
  0xd1   :  { %v101_v22 = vadd.f32 %v99_v21, %v66_v20 }
  0xd3   :  { %103 = vst.msk [vmem:[#allocation2] sm:$0x3] %vm64_vm1, %v101_v22 }
  0xda   :  { %v107_v23 = vld [vmem:[#allocation2] sm:$0x3] }
  0xdb   :  { %331 = vmatmul.mubr.msk.f32.vlgmr.msra.gmra.mrb[0].mxu0 %vm116_vm4, %v107_v23 }
 0x1ae   :  { %v189_v29 = vpop.f32.mrb[0].mxu0 }
 0x1af   :  { %v190_v30 = vadd.f32 %v317_v28, %v189_v29  ;;  %v332_v31 = vpop.f32.mrb[1].mxu0 }
 0x1b1   :  { %v193_v32 = vmax.f32 %v190_v30, 0.0 }
 0x1b3   :  { %338 = vmatmul.mubr.msk.f32.vlgmr.msra.gmra.mrb[0].mxu1 %vm203_vm5, %v193_v32 }
 0x286   :  { %v273_v34 = vpop.f32.mrb[0].mxu1 }
 0x287   :  { %v274_v36 = vadd.f32 %v320_v33, %v273_v34  ;;  %v339_v37 = vpop.f32.mrb[1].mxu1 }
 0x289   :  { %v286_v38 = vsel %vm551_vm8, %v274_v36, -inf  ;;  %v322_v45 = vmul.f32 -1.442695, %v274_v36 }
 0x28a   :  { %v288_v39 = vsel %vm287_vm9, %v286_v38, -inf }
 0x28b   :  { %289 = vmax.xlane.f32.xlu1 %v288_v39 }
 0x318   :  { %v290_v40 = vpop.xlane.xlu1 %289 }
 0x319   :  { %v291_v41 = vsub.f32 %v286_v38, %v290_v40 }
 0x31b   :  { %v292_v42 = vmul.f32 1.442695, %v291_v41 }
 0x31d   :  { %354 = vpow2.f32 %v292_v42 }
 0x31e   :  { %356 = vpow2.f32 %v322_v45 }
 0x327   :  { %v355_v43 = vpop.eup %354 }
 0x328   :  { %v294_v44 = vsel %vm287_vm9, %v355_v43, 0.0  ;;  %v357_v46 = vpop.eup %356 }
 0x329   :  { %295 = vadd.xlane.f32.xlu1 %v294_v44  ;;  %v280_v47 = vadd.f32 1.0, %v357_v46 }
 0x3b6   :  { %v296_v48 = vpop.xlane.xlu1 %295 }
 0x3b7   :  { %358 = vrcp.f32 %v296_v48 }
 0x3b8   :  { %360 = vrcp.f32 %v280_v47 }
 0x3c1   :  { %v359_v49 = vpop.eup %358 }
 0x3c2   :  { %v298_v50 = vmul.f32 %v359_v49, %v355_v43  ;;  %v361_v51 = vpop.eup %360 }
 0x3c4   :  { %v299_v52 = vsel %vm551_vm8, %v298_v50, %v361_v51 }
 0x3c5   :  { %300 = vst [vmem:[#allocation9] sm:$0x3] %v299_v52 }
 0x3c6   :  { %439 = shalt.err (!%p436_p0)
}
 0x3c7   :  { %s440_s10 = scalar_lea.hbm %s576_s5, 32 }
 0x3c8   :  { %p441_p1 = scmp.ne.s32.totalorder %s576_s5, %s440_s10  ;;  %p444_p2 = scmp.lt.u32.totalorder %s440_s10, %s576_s5 }
 0x3ca   :  { %p446_p3 = pnand %p444_p2, %p441_p1 }
 0x3cc   :  { %449 = shalt.err (!%p446_p3)
}
 0x3cd   :  { %310 = dma.vmem_to_hbm [thread:$0]  %s308_s4, 32, %s576_s5, [#allocation5]  }
 0x3ce   :  { %454 = dma.done.wait [#allocation5], 32  }
 0x3cf   :  { %455 = vsyncadd [#allocation5], 4294967264 }
 0x3d0   :  { %314 = vsyncpa [#allocation4], 1 }
 0x3d1   :  { %315 = vsyncpa [#allocation7], 1 }
 0x3d2   :  { %316 = vsyncpa [#allocation5], 1 }

</bundles_post_ra>
